<compile_context>
chip_gen: v5e
topology: v5e:2x2
jax: 0.10.0
libtpu: 0.0.40
codegen_flags: <defaults>
</compile_context>

<pallas_src>
import jax
import jax.numpy as jnp
from jax.experimental import pallas as pl
from jax.experimental.pallas import tpu as pltpu


def _round_up(x, m):
    return ((x + m - 1) // m) * m


# ---------------------------------------------------------------------------
# Kernel
# ---------------------------------------------------------------------------
def _make_kernel(T, pad, K, dilation, C_in, C_out, *,
                 has_downsample, use_carry, compute_dtype):
    halo = 2 * pad          # x history needed to recompute h for the tile + its own pad lookback
    Tw = T + pad            # hidden steps computed per tile (tile + conv2 lookback)

    def kernel(*refs):
        i = 0
        x_ref = refs[i]; i += 1
        w1_ref = refs[i]; i += 1
        b1_ref = refs[i]; i += 1
        w2_ref = refs[i]; i += 1
        b2_ref = refs[i]; i += 1
        wd_ref = bd_ref = None
        if has_downsample:
            wd_ref = refs[i]; i += 1
            bd_ref = refs[i]; i += 1
        out_ref = refs[i]; i += 1
        h_ref = refs[i]; i += 1                    # (C_out, Tw) VMEM scratch
        carry_ref = refs[i] if use_carry else None  # (C_in, 2*pad) VMEM scratch

        j = pl.program_id(1)                 # time-tile index (in-order per core)
        x_cur = x_ref[0]                     # (C_in, T), compute_dtype

        # ---- causal input window: 2*pad carried history columns + current tile
        if pad > 0:
            if use_carry:
                @pl.when(j == 0)
                def _():                     # sequence start: zero history
                    carry_ref[...] = jnp.zeros_like(carry_ref)
                tail = carry_ref[...]        # (C_in, 2*pad)
            else:
                tail = jnp.zeros((C_in, halo), x_cur.dtype)
            x_win = jnp.concatenate([tail, x_cur], axis=-1)    # (C_in, T + 2*pad)
        else:
            x_win = x_cur

        # carry the last 2*pad input columns for the next time tile
        if use_carry:
            carry_ref[...] = x_cur[:, T - halo:]

        # ---- conv1: K dilated taps fused into one im2col matmul -------------
        taps1 = [x_win[:, k * dilation: k * dilation + Tw] for k in range(K)]
        slab1 = taps1[0] if K == 1 else jnp.concatenate(taps1, axis=0)   # (K*C_in, Tw)
        acc1 = jnp.dot(w1_ref[...], slab1,
                       preferred_element_type=jnp.float32)               # (C_out, Tw) f32
        h_ref[...] = jnp.maximum(acc1 + b1_ref[...], 0.0).astype(compute_dtype)

        if pad > 0:
            # hidden steps with global time < 0 must be exact zeros (conv2 sees
            # zero left-padding, not conv1 of padded x). Only the first time
            # tile contains any such steps, so gate the masking on j == 0.
            @pl.when(j == 0)
            def _():
                lane = jax.lax.broadcasted_iota(jnp.int32, (1, Tw), 1)
                hv = h_ref[...]
                h_ref[...] = jnp.where(lane < pad, jnp.zeros_like(hv), hv)

        # ---- conv2: same fused-tap matmul, taps read from VMEM-staged h -----
        taps2 = [h_ref[:, k * dilation: k * dilation + T] for k in range(K)]
        slab2 = taps2[0] if K == 1 else jnp.concatenate(taps2, axis=0)   # (K*C_out, T)
        acc2 = jnp.dot(w2_ref[...], slab2,
                       preferred_element_type=jnp.float32)               # (C_out, T) f32
        out = jnp.maximum(acc2 + b2_ref[...], 0.0)

        # ---- residual path ---------------------------------------------------
        if has_downsample:
            res = jnp.dot(wd_ref[...], x_cur,
                          preferred_element_type=jnp.float32) + bd_ref[...]
        else:
            res = x_cur.astype(jnp.float32)

        out_ref[0] = jnp.maximum(out + res, 0.0).astype(out_ref.dtype)

    return kernel


# ---------------------------------------------------------------------------
# Tile sizing from an explicit VMEM byte budget
# ---------------------------------------------------------------------------
def _estimate_tile_vmem_bytes(T, pad, C_in, C_out, K, out_bytes):
    """Approximate per-time-tile VMEM footprint (inputs/outputs double-buffered
    by the pipeline + scratch + compiler-managed temporaries)."""
    Tw = T + pad
    bf16, f32 = 2, 4
    b = 2 * C_in * T * bf16              # x input block, double-buffered
    b += 2 * C_out * T * out_bytes       # output block, double-buffered
    b += C_out * Tw * bf16               # staged hidden activation (scratch)
    b += C_in * (T + 2 * pad) * bf16     # x_win temporary
    b += K * C_in * Tw * bf16            # conv1 im2col slab
    b += C_out * Tw * f32                # conv1 f32 accumulator
    b += K * C_out * T * bf16            # conv2 im2col slab
    b += 2 * C_out * T * f32             # conv2 accumulator + residual/out temp
    return b


def _choose_time_tile(L, pad, C_in, C_out, K, out_bytes, vmem_limit_bytes,
                      max_time_tile, has_downsample):
    bf16, f32 = 2, 4
    L128 = _round_up(max(L, 128), 128)
    t_min = max(128, _round_up(max(2 * pad, 1), 128))   # T must cover the halo
    t_max = max(t_min, min(_round_up(max_time_tile, 128), L128))
    # T-independent VMEM: weights + biases (double-buffered by default)
    fixed = 2 * (C_out * K * C_in * bf16 + C_out * K * C_out * bf16 + 2 * C_out * f32)
    if has_downsample:
        fixed += 2 * (C_out * C_in * bf16 + C_out * f32)
    # Leave headroom for Mosaic internal scratch / semaphores / rounding.
    budget = max(int(0.6 * vmem_limit_bytes) - fixed, 0)
    T = t_min
    for cand in range(t_max, t_min - 1, -128):
        if _estimate_tile_vmem_bytes(cand, pad, C_in, C_out, K, out_bytes) <= budget:
            T = cand
            break
    return T


def _default_vmem_limit():
    cap = 64 * 1024 * 1024               # conservative fallback (v7x per-TC)
    try:
        info = pltpu.get_tpu_info()
        cap = int(getattr(info, "vmem_capacity_bytes", cap))
    except Exception:
        pass
    # 3/4 of physical VMEM, capped at 96 MiB (v5e/v6e: 128 MiB; v7x: 64 MiB/TC).
    return min(96 * 1024 * 1024, (cap * 3) // 4)


# ---------------------------------------------------------------------------
# Wrapper
# ---------------------------------------------------------------------------
def temporal_block_pallas(x, params, *, kernel_size, dilation,
                          compute_dtype=jnp.bfloat16,
                          out_dtype=jnp.float32,
                          max_time_tile=2048,
                          vmem_limit_bytes=None,
                          single_buffer_weights=False):
    """x: (B, C_in, L) float32, PyTorch NCL layout. Returns (B, C_out, L) out_dtype."""
    B, C_in, L = x.shape
    w1 = params["w1"]                                   # (C_out, C_in, K)
    C_out = w1.shape[0]
    K = kernel_size
    pad = (K - 1) * dilation
    has_downsample = "wd" in params

    if vmem_limit_bytes is None:
        vmem_limit_bytes = _default_vmem_limit()
    out_bytes = jnp.dtype(out_dtype).itemsize

    # ---- lane-dense time tile from a VMEM byte budget; ragged L handled by
    #      right zero-padding (causal convs never look right, so the first L
    #      output columns are unaffected).
    T = _choose_time_tile(L, pad, C_in, C_out, K, out_bytes,
                          vmem_limit_bytes, max_time_tile, has_downsample)
    L_pad = _round_up(max(L, T), T)
    n_lt = L_pad // T
    use_carry = (n_lt > 1) and (pad > 0)

    xc = x.astype(compute_dtype)
    if L_pad != L:
        xc = jnp.pad(xc, ((0, 0), (0, 0), (0, L_pad - L)))

    # ---- pack operands: bf16 matmul inputs, f32 biases, taps folded into weights
    w1_flat = jnp.transpose(w1, (0, 2, 1)).reshape(C_out, K * C_in).astype(compute_dtype)
    w2_flat = jnp.transpose(params["w2"], (0, 2, 1)).reshape(C_out, K * C_out).astype(compute_dtype)
    b1 = params["b1"].reshape(C_out, 1).astype(jnp.float32)
    b2 = params["b2"].reshape(C_out, 1).astype(jnp.float32)

    # Constant-index blocks don't need double-buffering (VMEM saving on v7x for
    # large C_out). Off by default.
    wspec_kwargs = dict(pipeline_mode=pl.Buffered(1)) if single_buffer_weights else {}

    inputs = [xc, w1_flat, b1, w2_flat, b2]
    in_specs = [
        pl.BlockSpec((1, C_in, T), lambda b, j: (b, 0, j)),
        pl.BlockSpec((C_out, K * C_in), lambda b, j: (0, 0), **wspec_kwargs),
        pl.BlockSpec((C_out, 1), lambda b, j: (0, 0), **wspec_kwargs),
        pl.BlockSpec((C_out, K * C_out), lambda b, j: (0, 0), **wspec_kwargs),
        pl.BlockSpec((C_out, 1), lambda b, j: (0, 0), **wspec_kwargs),
    ]
    if has_downsample:
        wd = params["wd"][:, :, 0].astype(compute_dtype)              # (C_out, C_in)
        bd = params["bd"].reshape(C_out, 1).astype(jnp.float32)
        inputs += [wd, bd]
        in_specs += [pl.BlockSpec((C_out, C_in), lambda b, j: (0, 0), **wspec_kwargs),
                     pl.BlockSpec((C_out, 1), lambda b, j: (0, 0), **wspec_kwargs)]

    Tw = T + pad
    scratch_shapes = [pltpu.VMEM((C_out, Tw), compute_dtype)]          # staged h
    if use_carry:
        scratch_shapes.append(pltpu.VMEM((C_in, 2 * pad), compute_dtype))  # halo carry

    kernel = _make_kernel(T, pad, K, dilation, C_in, C_out,
                          has_downsample=has_downsample, use_carry=use_carry,
                          compute_dtype=compute_dtype)

    # NOTE(v7x): with 2 TensorCores the "parallel" batch axis is split across
    # cores; if B < 2 one could instead split the time axis into two contiguous
    # per-core chunks (each carrying its own halo scratch).
    out = pl.pallas_call(
        kernel,
        out_shape=jax.ShapeDtypeStruct((B, C_out, L_pad), out_dtype),
        grid_spec=pltpu.PrefetchScalarGridSpec(
            num_scalar_prefetch=0,
            grid=(B, n_lt),
            in_specs=in_specs,
            out_specs=pl.BlockSpec((1, C_out, T), lambda b, j: (b, 0, j)),
            scratch_shapes=scratch_shapes,
        ),
        compiler_params=pltpu.CompilerParams(
            # batch is independent (megacore-parallel); the time axis carries
            # the causal-halo scratch, so it must run in order -> "arbitrary".
            dimension_semantics=("parallel", "arbitrary"),
            vmem_limit_bytes=int(vmem_limit_bytes)),
    )(*inputs)

    if L_pad != L:
        out = out[:, :, :L]
    return out


# ---------------------------------------------------------------------------
# Pure-JAX reference (f32, for correctness check only)
# ---------------------------------------------------------------------------
def temporal_block_ref(x, params, *, kernel_size, dilation):
    pad = (kernel_size - 1) * dilation
    L = x.shape[-1]

    def causal_conv(xc, w, b):  # xc (B,Ci,L), w (Co,Ci,K)
        xp = jnp.pad(xc, ((0, 0), (0, 0), (pad, 0)))
        out = jnp.zeros((xc.shape[0], w.shape[0], L), jnp.float32)
        for k in range(kernel_size):
            out = out + jnp.einsum("bcl,oc->bol",
                                   xp[:, :, k * dilation:k * dilation + L],
                                   w[:, :, k])
        return out + b[None, :, None]

    h = jnp.maximum(causal_conv(x, params["w1"], params["b1"]), 0.0)
    o = jnp.maximum(causal_conv(h, params["w2"], params["b2"]), 0.0)
    if "wd" in params:
        res = jnp.einsum("bcl,oc->bol", x, params["wd"][:, :, 0]) \
              + params["bd"][None, :, None]
    else:
        res = x
    return jnp.maximum(o + res, 0.0)


# ---------------------------------------------------------------------------
# Deterministic parameter construction (weight_norm reparameterization folded)
# ---------------------------------------------------------------------------
def make_params(key, n_inputs, n_outputs, kernel_size):
    ks = jax.random.split(key, 6)

    def weight_norm_conv(k, c_out, c_in, ksz):
        # weight_norm: w = g * v / ||v|| (norm over (C_in, K) per out channel);
        # init_weights gives v ~ N(0, 0.01), g initialized to ||v||.
        v = 0.01 * jax.random.normal(k, (c_out, c_in, ksz), jnp.float32)
        norm = jnp.sqrt(jnp.sum(v * v, axis=(1, 2), keepdims=True)) + 1e-12
        g = norm
        return g * v / norm

    params = {
        "w1": weight_norm_conv(ks[0], n_outputs, n_inputs, kernel_size),
        "b1": 0.1 * jax.random.normal(ks[1], (n_outputs,), jnp.float32),
        "w2": weight_norm_conv(ks[2], n_outputs, n_outputs, kernel_size),
        "b2": 0.1 * jax.random.normal(ks[3], (n_outputs,), jnp.float32),
    }
    if n_inputs != n_outputs:
        params["wd"] = 0.01 * jax.random.normal(
            ks[4], (n_outputs, n_inputs, 1), jnp.float32)
        params["bd"] = 0.1 * jax.random.normal(ks[5], (n_outputs,), jnp.float32)
    return params


if __name__ == "__main__":
    key = jax.random.PRNGKey(0)
    k1, k2, k3, k4, k5, k6 = jax.random.split(key, 6)

    # Test 1: downsample path, dilation 2, L=256 forced into two 128-wide
    # time tiles -> exercises the VMEM halo carry.
    B, C_IN, C_OUT, L, KSZ, DIL = 2, 4, 8, 256, 3, 2
    x = jax.random.normal(k1, (B, C_IN, L), jnp.float32)
    params = make_params(k2, C_IN, C_OUT, KSZ)
    out = jax.block_until_ready(
        temporal_block_pallas(x, params, kernel_size=KSZ, dilation=DIL,
                              max_time_tile=128))
    ref = temporal_block_ref(x, params, kernel_size=KSZ, dilation=DIL)
    assert out.shape == (B, C_OUT, L)
    assert jnp.allclose(out, ref, atol=2e-2, rtol=2e-2), "mismatch vs reference (test 1)"

    # Test 1b: same block with bf16 output writeback (halved HBM writeback).
    out_bf16 = jax.block_until_ready(
        temporal_block_pallas(x, params, kernel_size=KSZ, dilation=DIL,
                              max_time_tile=128, out_dtype=jnp.bfloat16))
    assert out_bf16.dtype == jnp.bfloat16
    assert jnp.allclose(out_bf16.astype(jnp.float32), ref, atol=5e-2, rtol=5e-2), \
        "mismatch vs reference (test 1b, bf16 output)"

    # Test 2: identity-residual block (C_in == C_out), single time tile.
    B2, C2, L2, K2, D2 = 2, 8, 128, 2, 1
    x2 = jax.random.normal(k3, (B2, C2, L2), jnp.float32)
    params2 = make_params(k4, C2, C2, K2)
    out2 = jax.block_until_ready(
        temporal_block_pallas(x2, params2, kernel_size=K2, dilation=D2))
    ref2 = temporal_block_ref(x2, params2, kernel_size=K2, dilation=D2)
    assert out2.shape == (B2, C2, L2)
    assert jnp.allclose(out2, ref2, atol=2e-2, rtol=2e-2), "mismatch vs reference (test 2)"

    # Test 3: ragged length (L not a multiple of 128), larger channels,
    # dilation 4 -> exercises cdiv tiling + wrapper pad/slice + halo carry
    # across 3 tiles + first-tile-only masking.
    B3, C3I, C3O, L3, K3, D3 = 2, 16, 32, 300, 3, 4
    x3 = jax.random.normal(k5, (B3, C3I, L3), jnp.float32)
    params3 = make_params(k6, C3I, C3O, K3)
    out3 = jax.block_until_ready(
        temporal_block_pallas(x3, params3, kernel_size=K3, dilation=D3,
                              max_time_tile=128))
    ref3 = temporal_block_ref(x3, params3, kernel_size=K3, dilation=D3)
    assert out3.shape == (B3, C3O, L3)
    assert jnp.allclose(out3, ref3, atol=2e-2, rtol=2e-2), "mismatch vs reference (test 3)"

    print("KERNEL_OK")
</pallas_src>

<mosaic_0001>
module attributes {stable_mosaic.version = 11 : i64} {
  func.func @kernel(%arg0: i32, %arg1: i32, %arg2: memref<1x4x128xbf16, #tpu.memory_space<vmem>>, %arg3: memref<8x12xbf16, #tpu.memory_space<vmem>>, %arg4: memref<8x1xf32, #tpu.memory_space<vmem>>, %arg5: memref<8x24xbf16, #tpu.memory_space<vmem>>, %arg6: memref<8x1xf32, #tpu.memory_space<vmem>>, %arg7: memref<8x4xbf16, #tpu.memory_space<vmem>>, %arg8: memref<8x1xf32, #tpu.memory_space<vmem>>, %arg9: memref<1x8x128xf32, #tpu.memory_space<vmem>>, %arg10: memref<8x132xbf16, #tpu.memory_space<vmem>>, %arg11: memref<4x8xbf16, #tpu.memory_space<vmem>>) attributes {dimension_semantics = [#tpu.dimension_semantics<parallel>, #tpu.dimension_semantics<arbitrary>], iteration_bounds = array<i64: 2, 2>, scalar_prefetch = 0 : i64, scratch_operands = 2 : i64, tpu.core_type = #tpu.core_type<tc>, window_params = [{transform_indices = @transform_0, window_bounds = array<i64: 1, 4, 128>}, {pipeline_mode = #tpu.pipeline_mode<synchronous>, transform_indices = @transform_1, window_bounds = array<i64: 8, 12>}, {pipeline_mode = #tpu.pipeline_mode<synchronous>, transform_indices = @transform_2, window_bounds = array<i64: 8, 1>}, {pipeline_mode = #tpu.pipeline_mode<synchronous>, transform_indices = @transform_3, window_bounds = array<i64: 8, 24>}, {pipeline_mode = #tpu.pipeline_mode<synchronous>, transform_indices = @transform_4, window_bounds = array<i64: 8, 1>}, {pipeline_mode = #tpu.pipeline_mode<synchronous>, transform_indices = @transform_5, window_bounds = array<i64: 8, 4>}, {pipeline_mode = #tpu.pipeline_mode<synchronous>, transform_indices = @transform_6, window_bounds = array<i64: 8, 1>}, {transform_indices = @transform_7, window_bounds = array<i64: 1, 8, 128>}]} {
    %c0 = arith.constant 0 : index
    %c0_0 = arith.constant 0 : index
    %c0_1 = arith.constant 0 : index
    %0 = vector.load %arg2[%c0, %c0_0, %c0_1] : memref<1x4x128xbf16, #tpu.memory_space<vmem>>, vector<1x4x128xbf16>
    %1 = vector.shape_cast %0 : vector<1x4x128xbf16> to vector<4x128xbf16>
    %c0_i32 = arith.constant 0 : i32
    %2 = arith.cmpi eq, %arg1, %c0_i32 : i32
    %3 = arith.extui %2 : i1 to i32
    %c0_i32_2 = arith.constant 0 : i32
    %4 = arith.cmpi ne, %3, %c0_i32_2 : i32
    scf.if %4 {
      %cst_35 = arith.constant 0.000000e+00 : bf16
      %47 = vector.broadcast %cst_35 : bf16 to vector<4x8xbf16>
      %c0_36 = arith.constant 0 : index
      %c0_37 = arith.constant 0 : index
      %48 = vector.load %arg11[%c0_36, %c0_37] : memref<4x8xbf16, #tpu.memory_space<vmem>>, vector<4x8xbf16>
      tpu.vector_store %arg11[%c0_36, %c0_37], %47 {strides = array<i32>} : memref<4x8xbf16, #tpu.memory_space<vmem>>, vector<4x8xbf16>,
    } else {
    }
    %c0_3 = arith.constant 0 : index
    %c0_4 = arith.constant 0 : index
    %5 = vector.load %arg11[%c0_3, %c0_4] : memref<4x8xbf16, #tpu.memory_space<vmem>>, vector<4x8xbf16>
    %6 = tpu.concatenate %5, %1 in 1 : vector<4x8xbf16>, vector<4x128xbf16> -> vector<4x136xbf16>
    %7 = vector.extract_strided_slice %1 {offsets = [0, 120], sizes = [4, 8], strides = [1, 1]} : vector<4x128xbf16> to vector<4x8xbf16>
    %c0_5 = arith.constant 0 : index
    %c0_6 = arith.constant 0 : index
    %8 = vector.load %arg11[%c0_5, %c0_6] : memref<4x8xbf16, #tpu.memory_space<vmem>>, vector<4x8xbf16>
    tpu.vector_store %arg11[%c0_5, %c0_6], %7 {strides = array<i32>} : memref<4x8xbf16, #tpu.memory_space<vmem>>, vector<4x8xbf16>,
    %9 = vector.extract_strided_slice %6 {offsets = [0, 0], sizes = [4, 132], strides = [1, 1]} : vector<4x136xbf16> to vector<4x132xbf16>
    %10 = vector.extract_strided_slice %6 {offsets = [0, 2], sizes = [4, 132], strides = [1, 1]} : vector<4x136xbf16> to vector<4x132xbf16>
    %11 = vector.extract_strided_slice %6 {offsets = [0, 4], sizes = [4, 132], strides = [1, 1]} : vector<4x136xbf16> to vector<4x132xbf16>
    %12 = tpu.concatenate %9, %10, %11 in 0 : vector<4x132xbf16>, vector<4x132xbf16>, vector<4x132xbf16> -> vector<12x132xbf16>
    %c0_7 = arith.constant 0 : index
    %c0_8 = arith.constant 0 : index
    %13 = vector.load %arg3[%c0_7, %c0_8] : memref<8x12xbf16, #tpu.memory_space<vmem>>, vector<8x12xbf16>
    %cst = arith.constant dense<0.000000e+00> : vector<8x132xf32>
    %14 = tpu.matmul %13, %12, %cst {dimension_numbers = #tpu.dot_dimension_numbers<[1], [0], [0], [1], [0, 0, 1, 1], [], []>} : vector<8x12xbf16>, vector<12x132xbf16>, vector<8x132xf32> -> vector<8x132xf32>
    %c0_9 = arith.constant 0 : index
    %c0_10 = arith.constant 0 : index
    %15 = vector.load %arg4[%c0_9, %c0_10] : memref<8x1xf32, #tpu.memory_space<vmem>>, vector<8x1xf32>
    %16 = vector.broadcast %15 : vector<8x1xf32> to vector<8x132xf32>
    %17 = arith.addf %14, %16 : vector<8x132xf32>
    %cst_11 = arith.constant 0.000000e+00 : f32
    %18 = vector.broadcast %cst_11 : f32 to vector<8x132xf32>
    %19 = arith.maximumf %17, %18 : vector<8x132xf32>
    %20 = arith.truncf %19 : vector<8x132xf32> to vector<8x132xbf16>
    %c0_12 = arith.constant 0 : index
    %c0_13 = arith.constant 0 : index
    %21 = vector.load %arg10[%c0_12, %c0_13] : memref<8x132xbf16, #tpu.memory_space<vmem>>, vector<8x132xbf16>
    tpu.vector_store %arg10[%c0_12, %c0_13], %20 {strides = array<i32>} : memref<8x132xbf16, #tpu.memory_space<vmem>>, vector<8x132xbf16>,
    %c0_i32_14 = arith.constant 0 : i32
    %22 = arith.cmpi eq, %arg1, %c0_i32_14 : i32
    %23 = arith.extui %22 : i1 to i32
    %c0_i32_15 = arith.constant 0 : i32
    %24 = arith.cmpi ne, %23, %c0_i32_15 : i32
    scf.if %24 {
      %47 = tpu.iota {dimensions = array<i32: 1>} : vector<1x132xi32>
      %c0_35 = arith.constant 0 : index
      %c0_36 = arith.constant 0 : index
      %48 = vector.load %arg10[%c0_35, %c0_36] : memref<8x132xbf16, #tpu.memory_space<vmem>>, vector<8x132xbf16>
      %c4_i32 = arith.constant 4 : i32
      %49 = vector.broadcast %c4_i32 : i32 to vector<1x132xi32>
      %50 = arith.cmpi slt, %47, %49 : vector<1x132xi32>
      %cst_37 = arith.constant 0.000000e+00 : bf16
      %51 = vector.broadcast %cst_37 : bf16 to vector<8x132xbf16>
      %52 = vector.shape_cast %50 : vector<1x132xi1> to vector<1x132xi1>
      %53 = vector.broadcast %52 : vector<1x132xi1> to vector<8x132xi1>
      %54 = arith.select %53, %51, %48 : vector<8x132xi1>, vector<8x132xbf16>
      %c0_38 = arith.constant 0 : index
      %c0_39 = arith.constant 0 : index
      %55 = vector.load %arg10[%c0_38, %c0_39] : memref<8x132xbf16, #tpu.memory_space<vmem>>, vector<8x132xbf16>
      tpu.vector_store %arg10[%c0_38, %c0_39], %54 {strides = array<i32>} : memref<8x132xbf16, #tpu.memory_space<vmem>>, vector<8x132xbf16>,
    } else {
    }
    %c0_16 = arith.constant 0 : index
    %c0_17 = arith.constant 0 : index
    %25 = vector.load %arg10[%c0_16, %c0_17] : memref<8x132xbf16, #tpu.memory_space<vmem>>, vector<8x128xbf16>
    %c0_18 = arith.constant 0 : index
    %c2 = arith.constant 2 : index
    %26 = vector.load %arg10[%c0_18, %c2] : memref<8x132xbf16, #tpu.memory_space<vmem>>, vector<8x128xbf16>
    %c0_19 = arith.constant 0 : index
    %c4 = arith.constant 4 : index
    %27 = vector.load %arg10[%c0_19, %c4] : memref<8x132xbf16, #tpu.memory_space<vmem>>, vector<8x128xbf16>
    %28 = tpu.concatenate %25, %26, %27 in 0 : vector<8x128xbf16>, vector<8x128xbf16>, vector<8x128xbf16> -> vector<24x128xbf16>
    %c0_20 = arith.constant 0 : index
    %c0_21 = arith.constant 0 : index
    %29 = vector.load %arg5[%c0_20, %c0_21] : memref<8x24xbf16, #tpu.memory_space<vmem>>, vector<8x24xbf16>
    %cst_22 = arith.constant dense<0.000000e+00> : vector<8x128xf32>
    %30 = tpu.matmul %29, %28, %cst_22 {dimension_numbers = #tpu.dot_dimension_numbers<[1], [0], [0], [1], [0, 0, 1, 1], [], []>} : vector<8x24xbf16>, vector<24x128xbf16>, vector<8x128xf32> -> vector<8x128xf32>
    %c0_23 = arith.constant 0 : index
    %c0_24 = arith.constant 0 : index
    %31 = vector.load %arg6[%c0_23, %c0_24] : memref<8x1xf32, #tpu.memory_space<vmem>>, vector<8x1xf32>
    %32 = vector.broadcast %31 : vector<8x1xf32> to vector<8x128xf32>
    %33 = arith.addf %30, %32 : vector<8x128xf32>
    %cst_25 = arith.constant 0.000000e+00 : f32
    %34 = vector.broadcast %cst_25 : f32 to vector<8x128xf32>
    %35 = arith.maximumf %33, %34 : vector<8x128xf32>
    %c0_26 = arith.constant 0 : index
    %c0_27 = arith.constant 0 : index
    %36 = vector.load %arg7[%c0_26, %c0_27] : memref<8x4xbf16, #tpu.memory_space<vmem>>, vector<8x4xbf16>
    %cst_28 = arith.constant dense<0.000000e+00> : vector<8x128xf32>
    %37 = tpu.matmul %36, %1, %cst_28 {dimension_numbers = #tpu.dot_dimension_numbers<[1], [0], [0], [1], [0, 0, 1, 1], [], []>} : vector<8x4xbf16>, vector<4x128xbf16>, vector<8x128xf32> -> vector<8x128xf32>
    %c0_29 = arith.constant 0 : index
    %c0_30 = arith.constant 0 : index
    %38 = vector.load %arg8[%c0_29, %c0_30] : memref<8x1xf32, #tpu.memory_space<vmem>>, vector<8x1xf32>
    %39 = vector.broadcast %38 : vector<8x1xf32> to vector<8x128xf32>
    %40 = arith.addf %37, %39 : vector<8x128xf32>
    %41 = arith.addf %35, %40 : vector<8x128xf32>
    %cst_31 = arith.constant 0.000000e+00 : f32
    %42 = vector.broadcast %cst_31 : f32 to vector<8x128xf32>
    %43 = arith.maximumf %41, %42 : vector<8x128xf32>
    %c0_32 = arith.constant 0 : index
    %c0_33 = arith.constant 0 : index
    %c0_34 = arith.constant 0 : index
    %44 = vector.load %arg9[%c0_32, %c0_33, %c0_34] : memref<1x8x128xf32, #tpu.memory_space<vmem>>, vector<1x8x128xf32>
    %45 = vector.shape_cast %44 : vector<1x8x128xf32> to vector<8x128xf32>
    %46 = vector.shape_cast %43 : vector<8x128xf32> to vector<1x8x128xf32>
    tpu.vector_store %arg9[%c0_32, %c0_33, %c0_34], %46 {strides = array<i32>} : memref<1x8x128xf32, #tpu.memory_space<vmem>>, vector<1x8x128xf32>,
    return
  }
  func.func @transform_0(%arg0: i32, %arg1: i32) -> (i32, i32, i32) {
    %c0_i32 = arith.constant 0 : i32
    %c0_i32_0 = arith.constant 0 : i32
    return %arg0, %c0_i32, %arg1 : i32, i32, i32
  }
  func.func @transform_1(%arg0: i32, %arg1: i32) -> (i32, i32) {
    %c0_i32 = arith.constant 0 : i32
    %c0_i32_0 = arith.constant 0 : i32
    %c0_i32_1 = arith.constant 0 : i32
    return %c0_i32, %c0_i32_0 : i32, i32
  }
  func.func @transform_2(%arg0: i32, %arg1: i32) -> (i32, i32) {
    %c0_i32 = arith.constant 0 : i32
    %c0_i32_0 = arith.constant 0 : i32
    %c0_i32_1 = arith.constant 0 : i32
    return %c0_i32, %c0_i32_0 : i32, i32
  }
  func.func @transform_3(%arg0: i32, %arg1: i32) -> (i32, i32) {
    %c0_i32 = arith.constant 0 : i32
    %c0_i32_0 = arith.constant 0 : i32
    %c0_i32_1 = arith.constant 0 : i32
    return %c0_i32, %c0_i32_0 : i32, i32
  }
  func.func @transform_4(%arg0: i32, %arg1: i32) -> (i32, i32) {
    %c0_i32 = arith.constant 0 : i32
    %c0_i32_0 = arith.constant 0 : i32
    %c0_i32_1 = arith.constant 0 : i32
    return %c0_i32, %c0_i32_0 : i32, i32
  }
  func.func @transform_5(%arg0: i32, %arg1: i32) -> (i32, i32) {
    %c0_i32 = arith.constant 0 : i32
    %c0_i32_0 = arith.constant 0 : i32
    %c0_i32_1 = arith.constant 0 : i32
    return %c0_i32, %c0_i32_0 : i32, i32
  }
  func.func @transform_6(%arg0: i32, %arg1: i32) -> (i32, i32) {
    %c0_i32 = arith.constant 0 : i32
    %c0_i32_0 = arith.constant 0 : i32
    %c0_i32_1 = arith.constant 0 : i32
    return %c0_i32, %c0_i32_0 : i32, i32
  }
  func.func @transform_7(%arg0: i32, %arg1: i32) -> (i32, i32, i32) {
    %c0_i32 = arith.constant 0 : i32
    %c0_i32_0 = arith.constant 0 : i32
    return %arg0, %c0_i32, %arg1 : i32, i32, i32
  }
}

</mosaic_0001>

<bundles_post_ra>
// kernel: tpu_custom_call.1
= control target key start
LH: loop header
LB: loop body
LE: loop exit
PB: predicated region body
PF: predicated region fallthrough
CT: control target
= control target key end

     0   :  { %12 = vsyncpa [#allocation5], 0  ;;  %s1017_s0 = inlined_call_operand.vmem [shape: bf16[2,4,256], index: 0, kind: input, shape index: {}]   ;;  %s1018_s1 = inlined_call_operand.vmem [shape: bf16[8,12], index: 1, kind: input, shape index: {}]   ;;  %s1019_s2 = inlined_call_operand.vmem [shape: f32[8,1], index: 2, kind: input, shape index: {}]   ;;  %s1020_s3 = inlined_call_operand.vmem [shape: bf16[8,24], index: 3, kind: input, shape index: {}]   ;;  %s1021_s4 = inlined_call_operand.vmem [shape: f32[8,1], index: 4, kind: input, shape index: {}]   ;;  %s1022_s5 = inlined_call_operand.vmem [shape: bf16[8,4], index: 5, kind: input, shape index: {}]   ;;  %s1023_s6 = inlined_call_operand.vmem [shape: f32[8,1], index: 6, kind: input, shape index: {}]   ;;  %s1024_s7 = inlined_call_operand.hbm [shape: f32[2,8,256], index: 7, kind: output, shape index: {}]  }
   0x1   :  { %14 = vsyncpa [#allocation5 + $0x1], 0  ;;  %s834_s24 = smov 0   ;;  %s836_s25 = smov 0  }
   0x2   :  { %s838_s26 = smov 0   ;;  %s840_s27 = smov 0  }
   0x3   :  { %s842_s28 = smov 0   ;;  %s844_s29 = smov 0  }
   0x4   :  { %s846_s30 = smov 0   ;;  %s848_s8 = smov 0  }
   0x5 LB: > { %s592_s9 = sadd.s32 4294967295, %s786_s8   ;;  %s593_s10 = sadd.s32 4294967294, %s786_s8   ;;  %s786_s8 = sphi %s848_s8, %s20_s8   ;;  %s782_s30 = sphi %s846_s30, %s1036_s30   ;;  %s778_s29 = sphi %s844_s29, %s1035_s29   ;;  %s774_s28 = sphi %s842_s28, %s1034_s28   ;;  %s770_s27 = sphi %s840_s27, %s1033_s27   ;;  %s766_s26 = sphi %s838_s26, %s1032_s26   ;;  %s762_s25 = sphi %s836_s25, %s1031_s25   ;;  %s758_s24 = sphi %s834_s24, %s1030_s24  }
   0x6   : > { %s29_s11 = sadd.s32 1, %s778_s29  ;;  %s32_s12 = sadd.s32 1, %s782_s30 }
   0x7   : > { %p30_p0 = scmp.ge.s32.totalorder %s29_s11, 2  ;;  %p205_p1 = scmp.ne.s32.totalorder %s766_s26, %s762_s25 }
   0x8   : > { %p206_p2 = scmp.eq.s32.totalorder %s592_s9, 3  ;;  %p211_p5 = scmp.ne.s32.totalorder %s762_s25, %s758_s24 }
   0x9   : > { %s1038_s11 = smov (%p30_p0, %s29_s11), 0  ;;  %s1040_s12 = smov (!%p30_p0, %s32_s12), %s782_s30 }
   0xa   : > { %s191_s13 = ssub.s32 %s778_s29, %s1038_s11  ;;  %p885_p3 = por %p206_p2, %p205_p1 }
   0xb   : > { %p34_p4 = scmp.ge.s32.totalorder %s1040_s12, 2  ;;  %p212_p6 = scmp.eq.s32.totalorder %s593_s10, 3 }
   0xc   : > { %p596_p7 = scmp.ge.s32.totalorder %s786_s8, 1  ;;  %p259_p9 = scmp.lt.s32.totalorder %s786_s8, 5 }
   0xd   : > { %s1042_s12 = smov (%p34_p4, %s1040_s12), 0  ;;  %p894_p8 = por %p212_p6, %p211_p5 }
   0xe   : > { %1027 = sst [smem:[#allocation7_spill]] %s1042_s12  ;;  %s190_s16 = ssub.s32 %s782_s30, %s1042_s12 }
   0xf   : > { %s195_s17 = sadd.s32 1, %s766_s26  ;;  %s192_s18 = sor.u32 %s191_s13, %s190_s16 }
  0x10   : > { %p260_p10 = pnand %p596_p7, %p259_p9  ;;  %p193_p11 = scmp.eq.s32.totalorder %s192_s18, 0 }
  0x11   : > { %s291_s20 = sand.u32 (!%p260_p10), 1, %s762_s25   ;;  %p294_p12 = scmp.lt.s32.totalorder (!%p260_p10), %s774_s28, 1 }
  0x12   : > { %s903_s19 = scalar_select %p193_p11, %s766_s26, %s195_s17  }
  0x13   : > { %263 = sbr.rel (%p260_p10) target bundleno = 715 (0x2cb), region = 48  ;;  %s909_s21 = sshll.u32 (!%p260_p10), %s291_s20, 3 }
  0x14   : > { %p296_p13 = scmp.lt.s32.totalorder (!%p260_p10), %s770_s27, 1  ;;  %s293_s12 = scalar_lea.vmem (!%p260_p10), [#allocation4], %s909_s21 }
  0x15   : > { %p600_p0 = scmp.ne.s32.totalorder (!%p260_p10), %s770_s27, 0 }
  0x18   : > { %s295_s22 = scalar_select %p294_p12, %s774_s28, 1 }
  0x19   : > { %s297_s23 = scalar_select %p296_p13, %s770_s27, 1 }
  0x1a   : > { %s598_s9 = sshll.u32 %s295_s22, 1  ;;  %307 = sbr.rel (%p600_p0) target bundleno = 33 (0x21), region = 52 }
  0x1b   : > { %s299_s10 = sadd.s32 %s598_s9, %s297_s23 }
  0x1c   : > { %s599_s13 = sshll.u32 %s299_s10, 1 }
  0x1d   : > { %s301_s18 = scalar_lea.vmem %s1017_s0, %s599_s13 }
  0x1e   : > { %v917_v0 = vld [vmem:[%s301_s18] sm:$0x3] }
  0x1f   : > { %vm308_vm0 = vcmask 58368   ;;  %v788_v1 = vmov 0  }
  0x20   : > { %309 = vst.msk [vmem:[#allocation3] sm:$0x3] %vm308_vm0, %v788_v1 }
  0x21 PF: > { %312 = vst [vmem:[#allocation1] ss:$4 sm:$0xff] %v917_v0  ;;  %s789_s22 = smov 8   ;;  %vm317_vm1 = vcmask 64512   ;;  %s790_s23 = smov 124   ;;  %v355_v10 = vld [vmem:[%s1019_s2] sm:$0xff] }
  0x22   : > { %s791_s9 = smov 126   ;;  %v792_v11 = vmov 0   ;;  %vm344_vm2 = vcmask 1041408   ;;  %vm349_vm3 = vcmask 1043456   ;;  %vm365_vm4 = vcmask 1045504  }
  0x23   : > { %688 = vset.pattern.permute.xlu2 %v792_v11  ;;  %689 = vset.pattern.permute.xlu0 %v792_v11  ;;  %vm334_vm5 = vcmask 1031168   ;;  %v354_v18 = vld [vmem:[%s1018_s1] sm:$0xf]  ;;  %vm361_vm6 = vcmask 97280   ;;  %vm342_vm7 = vcmask 1014784   ;;  %vm325_vm8 = vcmask 58368  }
  0x24   : > { %vm399_vm9 = vcmask 31748  }
  0x25   : > { %vm400_vm10 = vmor %vm399_vm9, %vm349_vm3 }
  0x27   : > { %v310_v3 = vld [vmem:[#allocation3] sm:$0x3] }
  0x28   : > { %v313_v2 = vld.sshfl [vmem:[#allocation1] sm:$0xff pattern:$0x73625140] }
  0x29   : > { %315 = vrot.lane.b32.xlu0 %v313_v2, %s789_s22 }
  0x9b   : > { %v316_v4 = vpop.permute.xlu0 %315 }
  0x9c   : > { %v320_v5 = vsel %vm317_vm1, %v310_v3, %v316_v4  ;;  %v337_v6 = vrot.slane %v316_v4, 4  ;;  %v329_v7 = vrot.slane %v316_v4, 6 }
  0x9d   : > { %v328_v8 = vrot.slane %v320_v5, 6  ;;  %v336_v9 = vrot.slane %v320_v5, 4 }
  0x9e   : > { %340 = vrot.lane.b32.xlu2 %v337_v6, %s790_s23  ;;  %332 = vrot.lane.b32.xlu1 %v329_v7, %s791_s9 }
  0x9f   : > { %330 = vrot.lane.b32.xlu0 %v328_v8, %s791_s9 }
  0xa6   : > { %338 = vrot.lane.b32.xlu1 %v336_v9, %s790_s23  ;;  %358 = vperm.xlu2 %688, %v355_v10  }
  0xa7   : > { %322 = vrot.lane.b32.xlu0 %v917_v0, %s789_s22 }
  0xf8   : > { %v341_v13 = vpop.permute.xlu2 %340 }
 0x100   : > { %v359_v27 = vpop.permute.xlu2 %358 }
 0x110   : > { %v333_v12 = vpop.permute.xlu1 %332 }
 0x111   : > { %v348_v14 = vsel %vm344_vm2, %v316_v4, %v333_v12  ;;  %v331_v16 = vpop.permute.xlu0 %330 }
 0x112   : > { %v353_v15 = vsel %vm349_vm3, %v348_v14, %v341_v13  ;;  %v335_v19 = vsel %vm334_vm5, %v331_v16, %v333_v12 }
 0x113   : > { %v368_v17 = vsel %vm365_vm4, %v353_v15, 0  ;;  %v346_v22 = vsel %vm344_vm2, %v320_v5, %v335_v19 }
 0x114   : > { %390 = vmatpush.bf16.msra.mxu1 %v368_v17 }
 0x117   : > { %602 = vmatmul.msk.bf16.vlgmr.msra.gmra.mxu1 %vm361_vm6, %v354_v18 }
 0x118   : > { %v339_v20 = vpop.permute.xlu1 %338 }
 0x119   : > { %v343_v21 = vsel %vm342_vm7, %v339_v20, %v341_v13  ;;  %v323_v25 = vpop.permute.xlu0 %322 }
 0x11a   : > { %v351_v23 = vsel %vm349_vm3, %v346_v22, %v343_v21  ;;  %326 = vst.msk [vmem:[#allocation3] sm:$0x3] %vm325_vm8, %v323_v25 }
 0x11b   : > { %v366_v24 = vsel %vm365_vm4, %v351_v23, 0 }
 0x11c   : > { %377 = vmatpush.bf16.msra.mxu0 %v366_v24 }
 0x11f   : > { %601 = vmatmul.msk.bf16.vlgmr.msra.gmra.mxu0 %vm361_vm6, %v354_v18 }
 0x194   : > { %v392_v26 = vpop.f32.mrf.mxu1 }
 0x195   : > { %v393_v28 = vadd.f32 %v392_v26, %v359_v27 }
 0x197   : > { %v397_v31 = vmax.f32 %v393_v28, 0.0 }
 0x19c   : > { %v379_v29 = vpop.f32.mrf.mxu0  ;;  %v394_v30 = vpop.f32.mrf.mxu1 }
 0x19d   : > { %v380_v32 = vadd.f32 %v379_v29, %v359_v27 }
 0x19f   : > { %v396_v33 = vmax.f32 %v380_v32, 0.0 }
 0x1a0   : > { %404 = sbr.rel (%p600_p0) target bundleno = 429 (0x1ad), region = 56 }
 0x1a1   : > { %v398_v34 = vpack.c.bf16 %v397_v31, %v396_v33 }
 0x1a3   : > { %401 = vst.msk [vmem:[#allocation2] sm:$0xff] %vm400_vm10, %v398_v34 }
 0x1a4   : > { %v381_v35 = vpop.f32.mrf.mxu0 }
 0x1a5   : > { %v405_v36 = vlaneseq  ;;  %vm793_vm12 = vmmov 0  }
 0x1a7   : > { %v406_v37 = vand.u32 127, %v405_v36 }
 0x1a9   : > { %vm409_vm11 = vcmp.lt.s32.totalorder %v406_v37, 4 }
 0x1aa   : > { %v408_v38 = vld [vmem:[#allocation2] sm:$0xff]  ;;  %vm415_vm13 = vmpackc.low %vm793_vm12, %vm409_vm11 }
 0x1ab   : > { %v416_v39 = vsel %vm415_vm13, 0, %v408_v38 }
 0x1ac   : > { %417 = vst.msk [vmem:[#allocation2] sm:$0xff] %vm400_vm10, %v416_v39 }
 0x1ad PF: > { %690 = vset.pattern.permute.xlu2 %v792_v11  ;;  %691 = vset.pattern.permute.xlu0 %v792_v11  ;;  %v478_v45 = vsel %vm344_vm2, %v917_v0, 0  ;;  %v467_v46 = vld [vmem:[%s1022_s5] sm:$0xf]  ;;  %vm474_vm14 = vcmask 31744   ;;  %vm446_vm15 = vcmask 195584   ;;  %s607_s18 = sshll.u32 %s774_s28, 1 }
 0x1ae   : > { %487 = vmatpush.bf16.msra.mxu3 %v478_v45  ;;  %v440_v47 = vld [vmem:[%s1021_s4] sm:$0xff]  ;;  %s507_s22 = sadd.s32 %s770_s27, %s607_s18  ;;  %s497_s27 = scalar_lea.sflag [#allocation5], %s291_s20 }
 0x1af   : > { %443 = vperm.xlu2 %690, %v440_v47   ;;  %v468_v48 = vld [vmem:[%s1023_s6] sm:$0xff]  ;;  %s608_s10 = sshll.u32 %s507_s22, 3  ;;  %s712_s13 = scalar_lea.hbm %s1024_s7, 32 }
 0x1b0   : > { %v439_v58 = vld [vmem:[%s1020_s3] sm:$0xf]  ;;  %s509_s17 = scalar_lea.hbm %s1024_s7, %s608_s10 }
 0x1b1   : > { %605 = vmatmul.msk.bf16.vlgmr.msra.gmra.mxu3 %vm474_vm14, %v467_v46 }
 0x1b3   : > { %v419_v40 = vld [vmem:[#allocation2] sm:$0xff] }
 0x1b4   : > { %v421_v41 = vunpack.c.l.b16 %v419_v40  ;;  %v422_v43 = vunpack.c.h.b16 %v419_v40  ;;  %v418_v56 = vld [vmem:[#allocation2] sm:$0xf] }
 0x1b6   : > { %v423_v42 = vpack.c.b16 %v421_v41, %v421_v41  ;;  %v424_v44 = vpack.c.b16 %v422_v43, %v422_v43 }
 0x1b7   : > { %471 = vperm.xlu2 %690, %v468_v48  }
 0x1b8   : > { %425 = vrot.lane.b32.xlu1 %v423_v42, %s791_s9  ;;  %430 = vrot.lane.b32.xlu0 %v423_v42, %s790_s23 }
 0x1c0   : > { %427 = vrot.lane.b32.xlu1 %v424_v44, %s791_s9  ;;  %432 = vrot.lane.b32.xlu0 %v424_v44, %s790_s23  ;;  %s511_s23 = sshll.u32 %s293_s12, 4  ;;  %s513_s9 = sshll.u32 %s509_s17, 4  ;;  %s512_s23 = int_to_ptr.vmem [resolvable:$true] %s511_s23  ;;  %s514_s9 = int_to_ptr.hbm [resolvable:$true] %s513_s9 }
 0x1c1   : > { %s706_s28 = sshra.s32 %s514_s9, 4  ;;  %s707_s28 = int_to_ptr.hbm [resolvable:$true] %s706_s28 }
 0x1c2   : > { %s708_s18 = scalar_lea.hbm %s707_s28, 8  ;;  %p713_p5 = scmp.lt.s32.totalorder %s707_s28, %s1024_s7 }
 0x1c3   : > { %p709_p1 = scmp.ne.s32.totalorder %s707_s28, %s708_s18  ;;  %p714_p6 = scmp.lt.s32.totalorder %s712_s13, %s708_s18 }
 0x1c5   : > { %p710_p2 = pnand %p709_p1, %p885_p3  ;;  %p715_p7 = por %p714_p6, %p713_p5 }
 0x1c7   : > { %p711_p4 = pneg %p710_p2 }
 0x1c9   : > { %p716_p9 = pnand %p715_p7, %p711_p4 }
 0x209   : > { %v444_v61 = vpop.permute.xlu2 %443 }
 0x211   : > { %v472_v62 = vpop.permute.xlu2 %471 }
 0x22a   : > { %v426_v49 = vpop.permute.xlu1 %425  ;;  %v431_v50 = vpop.permute.xlu0 %430 }
 0x232   : > { %v428_v51 = vpop.permute.xlu1 %427  ;;  %v433_v52 = vpop.permute.xlu0 %432 }
 0x233   : > { %v434_v53 = vsel %vm342_vm7, %v431_v50, %v433_v52  ;;  %v429_v55 = vsel %vm334_vm5, %v426_v49, %v428_v51 }
 0x234   : > { %v451_v54 = vsel %vm349_vm3, %v434_v53, 0  ;;  %v437_v57 = vsel %vm349_vm3, %v418_v56, %v429_v55  ;;  %v489_v59 = vpop.f32.mrf.mxu3 }
 0x235   : > { %459 = vmatpush.bf16.msra.mxu2 %v451_v54  ;;  %v490_v1 = vadd.f32 %v489_v59, %v472_v62 }
 0x239   : > { %460 = vmatpush.bf16.msra.mxu2 %v437_v57 }
 0x23c   : > { %604 = vmatmul.msk.bf16.vlgmr.msra.gmra.mxu2 %vm446_vm15, %v439_v58  ;;  %v491_v60 = vpop.f32.mrf.mxu3 }
 0x2bf   : > { %v462_v63 = vpop.f32.mrf.mxu2 }
 0x2c0   : > { %v463_v0 = vadd.f32 %v462_v63, %v444_v61 }
 0x2c2   : > { %v466_v2 = vmax.f32 %v463_v0, 0.0 }
 0x2c4   : > { %v493_v3 = vadd.f32 %v490_v1, %v466_v2 }
 0x2c6   : > { %v494_v4 = vmax.f32 %v493_v3, 0.0 }
 0x2c7   : > { %v464_v5 = vpop.f32.mrf.mxu2 }
 0x2c8   : > { %495 = vst [vmem:[%s293_s12] sm:$0xff] %v494_v4 }
 0x2c9   : > { %719 = shalt.err (!%p716_p9)
}
 0x2ca   : > { %611 = dma.vmem_to_hbm [thread:$0]  (%p885_p3), %s512_s23, 128, %s514_s9, %s497_s27  }
 0x2cb PF: > { %p617_p10 = scmp.ge.s32.totalorder %s786_s8, 2  ;;  %s525_s12 = sand.u32 1, %s758_s24  }
 0x2cc   : > { %s526_s20 = scalar_lea.sflag [#allocation5], %s525_s12 }
 0x2cd   : > { %p614_p11 = pnand %p617_p10, %p894_p8 }
 0x2cf   : > { %p615_p12 = pneg %p614_p11 }
 0x2d1   : > { %753 = dma.done.wait (%p615_p12), %s526_s20, 128  }
 0x2d2   : > { %755 = vsyncadd (%p615_p12), %s526_s20, 4294967168  ;;  %s20_s8 = sadd.s32 1, %s786_s8   ;;  %s1029_s14 = sld [smem:[#allocation7_spill]] }
 0x2d3   : > { %p17_p13 = scmp.ge.s32.totalorder %s20_s8, 6   ;;  %s1030_s24 = smov %s762_s25 }
 0x2d4   : > { %s1031_s25 = smov %s766_s26  ;;  %s1032_s26 = smov %s903_s19 }
 0x2d5   : > { %s1033_s27 = smov %s778_s29  ;;  %s1034_s28 = smov %s782_s30 }
 0x2d6   : > { %s1035_s29 = smov %s1038_s11  ;;  %19 = sbr.rel (!%p17_p13) target bundleno = 5 (0x5), region = 91 }
 0x2d8   : > { %s1036_s30 = smov %s1029_s14 }
 0x2db   :  { %532 = vsyncpa [#allocation5], 1 }
 0x2dc   :  { %534 = vsyncpa [#allocation5 + $0x1], 1 }

</bundles_post_ra>
